<compile_context>
chip_gen: v6e
topology: v6e:2x2x1
jax: 0.10.0
libtpu: 0.0.40
codegen_flags: <defaults>
</compile_context>

<pallas_src>
import jax
import jax.numpy as jnp
from jax.experimental import pallas as pl
from jax.experimental.pallas import tpu as pltpu


MAX_TILE_B = 8192  # batch rows per grid step (cap); whole batch in one step if smaller


def fc_affine_kernel(w_ref, b_ref, x_ref, o_ref):
    # x_ref: [tile_b, 10]   native layout (features on lanes)
    # w_ref: [10, 1] folded weight column, b_ref: [1, 1] folded bias
    # o_ref: [tile_b, 1]
    y = jnp.dot(x_ref[...], w_ref[...], preferred_element_type=jnp.float32)
    o_ref[...] = (y + b_ref[...]).astype(o_ref.dtype)


def fold_params(params):
    """Fold fc1/fc2/fc3 (torch Linear layout, y = x @ W.T + b) into one affine map."""
    w1, b1, w2, b2, w3, b3 = (params[k] for k in ("w1", "b1", "w2", "b2", "w3", "b3"))
    w_eff = w1.T @ w2.T @ w3.T                        # [10, 1]
    b_eff = (b1 @ w2.T + b2) @ w3.T + b3              # [1]
    return w_eff, b_eff.reshape(1, 1)


def fc_model_forward(x, params, max_tile_b=MAX_TILE_B):
    """x: [B, 10] float32 (PyTorch Linear layout). Returns [B, 1] float32."""
    B, D = x.shape
    assert D == 10
    w_eff, b_eff = fold_params(params)

    # Whole batch in one step when possible; otherwise 8-row-aligned tiles up to the cap.
    tile_b = min(max_tile_b, ((B + 7) // 8) * 8)
    num_tiles = pl.cdiv(B, tile_b)

    y = pl.pallas_call(
        fc_affine_kernel,
        out_shape=jax.ShapeDtypeStruct((B, 1), jnp.float32),
        grid=(num_tiles,),
        in_specs=[
            pl.BlockSpec((10, 1), lambda i: (0, 0)),          # w_eff: resident, <1 KiB
            pl.BlockSpec((1, 1), lambda i: (0, 0)),           # b_eff: resident
            pl.BlockSpec((tile_b, 10), lambda i: (i, 0)),     # x tile, native layout
        ],
        out_specs=pl.BlockSpec((tile_b, 1), lambda i: (i, 0)),
        compiler_params=pltpu.CompilerParams(
            dimension_semantics=("parallel",),                # shards across v7x's 2 TCs
        ),
        cost_estimate=pl.CostEstimate(
            flops=2 * B * 10,
            transcendentals=0,
            bytes_accessed=4 * (B * 10 + B + 10 + 1),
        ),
    )(w_eff, b_eff, x)
    return y


def init_params(key):
    """Deterministic init mimicking torch.nn.Linear default (uniform(-1/sqrt(fan_in), +))."""
    dims = [(5, 10), (3, 5), (1, 3)]  # (out_features, in_features) per layer
    params = {}
    for i, (out_f, in_f) in enumerate(dims, start=1):
        key, kw, kb = jax.random.split(key, 3)
        bound = 1.0 / jnp.sqrt(jnp.float32(in_f))
        params[f"w{i}"] = jax.random.uniform(kw, (out_f, in_f), jnp.float32, -bound, bound)
        params[f"b{i}"] = jax.random.uniform(kb, (out_f,), jnp.float32, -bound, bound)
    return params


if __name__ == "__main__":
    key = jax.random.PRNGKey(0)
    key, kx = jax.random.split(key)
    params = init_params(key)

    def ref_forward(x):
        # Layer-by-layer reference, same math as the unfused torch forward.
        y = x
        for i in (1, 2, 3):
            y = y @ params[f"w{i}"].T + params[f"b{i}"]
        return y

    # Case 1: small batch -> single-step grid (whole batch in one block, no pipeline overhead).
    B1 = 384
    x1 = jax.random.normal(kx, (B1, 10), jnp.float32)
    out1 = jax.block_until_ready(fc_model_forward(x1, params))
    assert out1.shape == (B1, 1)
    assert jnp.allclose(out1, ref_forward(x1), atol=1e-5, rtol=1e-5)

    # Case 2: multi-step grid with a ragged last tile (exercises the tiled/partial-block path).
    key, kx2 = jax.random.split(key)
    B2 = 333
    x2 = jax.random.normal(kx2, (B2, 10), jnp.float32)
    out2 = jax.block_until_ready(fc_model_forward(x2, params, max_tile_b=128))
    assert out2.shape == (B2, 1)
    assert jnp.allclose(out2, ref_forward(x2), atol=1e-5, rtol=1e-5)

    print("KERNEL_OK")
</pallas_src>

<mosaic_0001>
module attributes {stable_mosaic.version = 11 : i64} {
  func.func @fc_affine_kernel(%arg0: i32, %arg1: memref<10x1xf32, #tpu.memory_space<vmem>>, %arg2: memref<1x1xf32, #tpu.memory_space<vmem>>, %arg3: memref<384x10xf32, #tpu.memory_space<vmem>>, %arg4: memref<384x1xf32, #tpu.memory_space<vmem>>) attributes {dimension_semantics = [#tpu.dimension_semantics<parallel>], iteration_bounds = array<i64: 1>, scalar_prefetch = 0 : i64, scratch_operands = 0 : i64, tpu.core_type = #tpu.core_type<tc>, window_params = [{pipeline_mode = #tpu.pipeline_mode<synchronous>, transform_indices = @transform_0, window_bounds = array<i64: 10, 1>}, {pipeline_mode = #tpu.pipeline_mode<synchronous>, transform_indices = @transform_1, window_bounds = array<i64: 1, 1>}, {transform_indices = @transform_2, window_bounds = array<i64: 384, 10>}, {transform_indices = @transform_3, window_bounds = array<i64: 384, 1>}]} {
    %c0 = arith.constant 0 : index
    %c0_0 = arith.constant 0 : index
    %0 = vector.load %arg3[%c0, %c0_0] : memref<384x10xf32, #tpu.memory_space<vmem>>, vector<384x10xf32>
    %c0_1 = arith.constant 0 : index
    %c0_2 = arith.constant 0 : index
    %1 = vector.load %arg1[%c0_1, %c0_2] : memref<10x1xf32, #tpu.memory_space<vmem>>, vector<10x1xf32>
    %cst = arith.constant dense<0.000000e+00> : vector<384x1xf32>
    %2 = tpu.matmul %0, %1, %cst {dimension_numbers = #tpu.dot_dimension_numbers<[1], [0], [0], [1], [0, 0, 1, 1], [], []>} : vector<384x10xf32>, vector<10x1xf32>, vector<384x1xf32> -> vector<384x1xf32>
    %c0_3 = arith.constant 0 : index
    %c0_4 = arith.constant 0 : index
    %3 = vector.load %arg2[%c0_3, %c0_4] : memref<1x1xf32, #tpu.memory_space<vmem>>, vector<1x1xf32>
    %4 = vector.broadcast %3 : vector<1x1xf32> to vector<384x1xf32>
    %5 = arith.addf %2, %4 : vector<384x1xf32>
    %c0_5 = arith.constant 0 : index
    %c0_6 = arith.constant 0 : index
    %6 = vector.load %arg4[%c0_5, %c0_6] : memref<384x1xf32, #tpu.memory_space<vmem>>, vector<384x1xf32>
    tpu.vector_store %arg4[%c0_5, %c0_6], %5 {strides = array<i32>} : memref<384x1xf32, #tpu.memory_space<vmem>>, vector<384x1xf32>,
    return
  }
  func.func @transform_0(%arg0: i32) -> (i32, i32) {
    %c0_i32 = arith.constant 0 : i32
    %c0_i32_0 = arith.constant 0 : i32
    %c0_i32_1 = arith.constant 0 : i32
    return %c0_i32, %c0_i32_0 : i32, i32
  }
  func.func @transform_1(%arg0: i32) -> (i32, i32) {
    %c0_i32 = arith.constant 0 : i32
    %c0_i32_0 = arith.constant 0 : i32
    %c0_i32_1 = arith.constant 0 : i32
    return %c0_i32, %c0_i32_0 : i32, i32
  }
  func.func @transform_2(%arg0: i32) -> (i32, i32) {
    %c0_i32 = arith.constant 0 : i32
    %c0_i32_0 = arith.constant 0 : i32
    return %arg0, %c0_i32 : i32, i32
  }
  func.func @transform_3(%arg0: i32) -> (i32, i32) {
    %c0_i32 = arith.constant 0 : i32
    %c0_i32_0 = arith.constant 0 : i32
    return %arg0, %c0_i32 : i32, i32
  }
}

</mosaic_0001>

<bundles_post_ra>
// kernel: tpu_custom_call.1
= control target key start
LH: loop header
LB: loop body
LE: loop exit
PB: predicated region body
PF: predicated region fallthrough
CT: control target
= control target key end

     0   :  { %vm218_vm0 = vcmask 1041408   ;;  %vm73_vm1 = vcmask 80896   ;;  %vm527_vm2 = vcmask 7168   ;;  %s1223_s0 = inlined_call_operand.vmem [shape: f32[10,1], index: 0, kind: input, shape index: {}]   ;;  %s1224_s2 = inlined_call_operand.vmem [shape: f32[384,10], index: 2, kind: input, shape index: {}]   ;;  %s1225_s1 = inlined_call_operand.<no memory space> [shape: f32[1,1], index: 1, kind: input, shape index: {}]   ;;  %s1226_s3 = inlined_call_operand.vmem [shape: f32[384,1], index: 3, kind: output, shape index: {}]  }
   0x1   :  { %v65_v0 = vld [vmem:[%s1223_s0 + $0x8] sm:$0x3]  ;;  %v64_v1 = vld [vmem:[%s1223_s0] sm:$0xff]  ;;  %v8_v2 = vstv %s1225_s1  ;;  %v18_v7 = vld [vmem:[%s1224_s2 + $0x10] sm:$0xff] }
   0x2   :  { %680 = vmatprep.subr.msk.mxu0 %vm218_vm0, %v65_v0  ;;  %756 = vmatprep.subr.msk.mxu1 %vm218_vm0, %v65_v0  ;;  %9 = vst [vmem:[#allocation2] sm:$0x1] %v8_v2  ;;  %v16_v3 = vld [vmem:[%s1224_s2] sm:$0xff]  ;;  %v17_v5 = vld [vmem:[%s1224_s2 + $0x8] sm:$0xff]  ;;  %v42_v8 = vld [vmem:[%s1224_s2 + $0xd0] sm:$0xff] }
   0x3   :  { %681 = vmatpush3.msk.msra.mxu0 %vm218_vm0, %v65_v0  ;;  %758 = vmatpush3.msk.msra.mxu1 %vm218_vm0, %v65_v0  ;;  %v40_v4 = vld [vmem:[%s1224_s2 + $0xc0] sm:$0xff]  ;;  %v41_v6 = vld [vmem:[%s1224_s2 + $0xc8] sm:$0xff]  ;;  %v19_v9 = vld [vmem:[%s1224_s2 + $0x18] sm:$0xff] }
   0x4   :  { %682 = vmatprep.subr.mxu0 %v64_v1  ;;  %757 = vmatprep.subr.mxu1 %v64_v1  ;;  %v43_v10 = vld [vmem:[%s1224_s2 + $0xd8] sm:$0xff]  ;;  %v20_v11 = vld [vmem:[%s1224_s2 + $0x20] sm:$0xff]  ;;  %v21_v13 = vld [vmem:[%s1224_s2 + $0x28] sm:$0xff] }
   0x5   :  { %683 = vmatpush3.msra.mxu0 %v64_v1  ;;  %759 = vmatpush3.msra.mxu1 %v64_v1  ;;  %v44_v12 = vld [vmem:[%s1224_s2 + $0xe0] sm:$0xff]  ;;  %v45_v14 = vld [vmem:[%s1224_s2 + $0xe8] sm:$0xff]  ;;  %v22_v15 = vld [vmem:[%s1224_s2 + $0x30] sm:$0xff] }
   0x6   :  { %684 = vmatprep.mubr.msk.f32.mxu0 %vm73_vm1, %v16_v3  ;;  %720 = vmatprep.mubr.msk.f32.mxu1 %vm73_vm1, %v40_v4  ;;  %v46_v16 = vld [vmem:[%s1224_s2 + $0xf0] sm:$0xff]  ;;  %v23_v17 = vld [vmem:[%s1224_s2 + $0x38] sm:$0xff]  ;;  %v24_v19 = vld [vmem:[%s1224_s2 + $0x40] sm:$0xff] }
   0x7   :  { %685 = vmatmul.mubr.msk.f32.vlgmr.msra.gmra.mxu0 %vm73_vm1, %v17_v5  ;;  %721 = vmatmul.mubr.msk.f32.vlgmr.msra.gmra.mxu1 %vm73_vm1, %v41_v6  ;;  %v47_v18 = vld [vmem:[%s1224_s2 + $0xf8] sm:$0xff]  ;;  %v48_v20 = vld [vmem:[%s1224_s2 + $0x100] sm:$0xff]  ;;  %v25_v21 = vld [vmem:[%s1224_s2 + $0x48] sm:$0xff] }
   0x8   :  { %687 = vmatprep.mubr.msk.f32.mxu0 %vm73_vm1, %v18_v7  ;;  %723 = vmatprep.mubr.msk.f32.mxu1 %vm73_vm1, %v42_v8  ;;  %v49_v22 = vld [vmem:[%s1224_s2 + $0x108] sm:$0xff]  ;;  %v26_v23 = vld [vmem:[%s1224_s2 + $0x50] sm:$0xff]  ;;  %v27_v25 = vld [vmem:[%s1224_s2 + $0x58] sm:$0xff] }
   0x9   :  { %v50_v24 = vld [vmem:[%s1224_s2 + $0x110] sm:$0xff]  ;;  %v51_v26 = vld [vmem:[%s1224_s2 + $0x118] sm:$0xff]  ;;  %v28_v27 = vld [vmem:[%s1224_s2 + $0x60] sm:$0xff] }
   0xa   :  { %v52_v28 = vld [vmem:[%s1224_s2 + $0x120] sm:$0xff]  ;;  %v29_v29 = vld [vmem:[%s1224_s2 + $0x68] sm:$0xff]  ;;  %v30_v31 = vld [vmem:[%s1224_s2 + $0x70] sm:$0xff] }
   0xb   :  { %688 = vmatmul.mubr.msk.f32.gmra.mxu0 %vm73_vm1, %v19_v9  ;;  %724 = vmatmul.mubr.msk.f32.gmra.mxu1 %vm73_vm1, %v43_v10  ;;  %v53_v30 = vld [vmem:[%s1224_s2 + $0x128] sm:$0xff]  ;;  %v54_v32 = vld [vmem:[%s1224_s2 + $0x130] sm:$0xff]  ;;  %v31_v33 = vld [vmem:[%s1224_s2 + $0x78] sm:$0xff] }
   0xc   :  { %690 = vmatprep.mubr.msk.f32.mxu0 %vm73_vm1, %v20_v11  ;;  %726 = vmatprep.mubr.msk.f32.mxu1 %vm73_vm1, %v44_v12  ;;  %v55_v34 = vld [vmem:[%s1224_s2 + $0x138] sm:$0xff]  ;;  %v32_v35 = vld [vmem:[%s1224_s2 + $0x80] sm:$0xff]  ;;  %v33_v37 = vld [vmem:[%s1224_s2 + $0x88] sm:$0xff] }
   0xd   :  { %v56_v36 = vld [vmem:[%s1224_s2 + $0x140] sm:$0xff]  ;;  %v57_v38 = vld [vmem:[%s1224_s2 + $0x148] sm:$0xff]  ;;  %v34_v39 = vld [vmem:[%s1224_s2 + $0x90] sm:$0xff] }
   0xe   :  { %v58_v40 = vld [vmem:[%s1224_s2 + $0x150] sm:$0xff]  ;;  %v35_v41 = vld [vmem:[%s1224_s2 + $0x98] sm:$0xff]  ;;  %v36_v43 = vld [vmem:[%s1224_s2 + $0xa0] sm:$0xff] }
   0xf   :  { %691 = vmatmul.mubr.msk.f32.gmra.mxu0 %vm73_vm1, %v21_v13  ;;  %727 = vmatmul.mubr.msk.f32.gmra.mxu1 %vm73_vm1, %v45_v14  ;;  %v59_v42 = vld [vmem:[%s1224_s2 + $0x158] sm:$0xff]  ;;  %v60_v44 = vld [vmem:[%s1224_s2 + $0x160] sm:$0xff]  ;;  %v37_v45 = vld [vmem:[%s1224_s2 + $0xa8] sm:$0xff] }
  0x10   :  { %693 = vmatprep.mubr.msk.f32.mxu0 %vm73_vm1, %v22_v15  ;;  %729 = vmatprep.mubr.msk.f32.mxu1 %vm73_vm1, %v46_v16  ;;  %v61_v46 = vld [vmem:[%s1224_s2 + $0x168] sm:$0xff]  ;;  %v38_v47 = vld [vmem:[%s1224_s2 + $0xb0] sm:$0xff]  ;;  %v39_v49 = vld [vmem:[%s1224_s2 + $0xb8] sm:$0xff] }
  0x11   :  { %v62_v48 = vld [vmem:[%s1224_s2 + $0x170] sm:$0xff]  ;;  %v63_v50 = vld [vmem:[%s1224_s2 + $0x178] sm:$0xff]  ;;  %v981_v51 = vld [vmem:[#allocation2] ss:$0 sm:$0xff] }
  0x13   :  { %694 = vmatmul.mubr.msk.f32.gmra.mxu0 %vm73_vm1, %v23_v17  ;;  %730 = vmatmul.mubr.msk.f32.gmra.mxu1 %vm73_vm1, %v47_v18 }
  0x14   :  { %696 = vmatprep.mubr.msk.f32.mxu0 %vm73_vm1, %v24_v19  ;;  %732 = vmatprep.mubr.msk.f32.mxu1 %vm73_vm1, %v48_v20 }
  0x17   :  { %697 = vmatmul.mubr.msk.f32.gmra.mxu0 %vm73_vm1, %v25_v21  ;;  %733 = vmatmul.mubr.msk.f32.gmra.mxu1 %vm73_vm1, %v49_v22 }
  0x18   :  { %699 = vmatprep.mubr.msk.f32.mxu0 %vm73_vm1, %v26_v23  ;;  %735 = vmatprep.mubr.msk.f32.mxu1 %vm73_vm1, %v50_v24 }
  0x1b   :  { %700 = vmatmul.mubr.msk.f32.gmra.mxu0 %vm73_vm1, %v27_v25  ;;  %736 = vmatmul.mubr.msk.f32.gmra.mxu1 %vm73_vm1, %v51_v26 }
  0x1c   :  { %702 = vmatprep.mubr.msk.f32.mxu0 %vm73_vm1, %v28_v27  ;;  %738 = vmatprep.mubr.msk.f32.mxu1 %vm73_vm1, %v52_v28 }
  0x1f   :  { %703 = vmatmul.mubr.msk.f32.gmra.mxu0 %vm73_vm1, %v29_v29  ;;  %739 = vmatmul.mubr.msk.f32.gmra.mxu1 %vm73_vm1, %v53_v30 }
  0x20   :  { %705 = vmatprep.mubr.msk.f32.mxu0 %vm73_vm1, %v30_v31  ;;  %741 = vmatprep.mubr.msk.f32.mxu1 %vm73_vm1, %v54_v32 }
  0x23   :  { %706 = vmatmul.mubr.msk.f32.gmra.mxu0 %vm73_vm1, %v31_v33  ;;  %742 = vmatmul.mubr.msk.f32.gmra.mxu1 %vm73_vm1, %v55_v34 }
  0x24   :  { %708 = vmatprep.mubr.msk.f32.mxu0 %vm73_vm1, %v32_v35  ;;  %744 = vmatprep.mubr.msk.f32.mxu1 %vm73_vm1, %v56_v36 }
  0x27   :  { %709 = vmatmul.mubr.msk.f32.gmra.mxu0 %vm73_vm1, %v33_v37  ;;  %745 = vmatmul.mubr.msk.f32.gmra.mxu1 %vm73_vm1, %v57_v38 }
  0x28   :  { %711 = vmatprep.mubr.msk.f32.mxu0 %vm73_vm1, %v34_v39  ;;  %747 = vmatprep.mubr.msk.f32.mxu1 %vm73_vm1, %v58_v40 }
  0x2b   :  { %712 = vmatmul.mubr.msk.f32.gmra.mxu0 %vm73_vm1, %v35_v41  ;;  %748 = vmatmul.mubr.msk.f32.gmra.mxu1 %vm73_vm1, %v59_v42 }
  0x2c   :  { %714 = vmatprep.mubr.msk.f32.mxu0 %vm73_vm1, %v36_v43  ;;  %750 = vmatprep.mubr.msk.f32.mxu1 %vm73_vm1, %v60_v44 }
  0x2f   :  { %715 = vmatmul.mubr.msk.f32.gmra.mxu0 %vm73_vm1, %v37_v45  ;;  %751 = vmatmul.mubr.msk.f32.gmra.mxu1 %vm73_vm1, %v61_v46 }
  0x30   :  { %717 = vmatprep.mubr.msk.f32.mxu0 %vm73_vm1, %v38_v47  ;;  %753 = vmatprep.mubr.msk.f32.mxu1 %vm73_vm1, %v62_v48 }
  0x33   :  { %718 = vmatmul.mubr.msk.f32.gmra.mxu0 %vm73_vm1, %v39_v49  ;;  %754 = vmatmul.mubr.msk.f32.gmra.mxu1 %vm73_vm1, %v63_v50 }
  0xc7   :  { %v686_v52 = vpop.f32.mrf.mxu0  ;;  %v722_v53 = vpop.f32.mrf.mxu1 }
  0xc8   :  { %v294_v54 = vadd.f32 %v686_v52, %v981_v51  ;;  %v414_v55 = vadd.f32 %v722_v53, %v981_v51 }
  0xc9   :  { %v288_v56 = vpop.f32.mrf.mxu0  ;;  %v408_v57 = vpop.f32.mrf.mxu1 }
  0xca   :  { %529 = vst.msk [vmem:[%s1226_s3 + $0x8] sm:$0xff] %vm527_vm2, %v294_v54  ;;  %553 = vst.msk [vmem:[%s1226_s3 + $0xc8] sm:$0xff] %vm527_vm2, %v414_v55  ;;  %v289_v58 = vadd.f32 %v981_v51, %v288_v56  ;;  %v409_v59 = vadd.f32 %v981_v51, %v408_v57 }
  0xcb   :  { %v689_v60 = vpop.f32.mrf.mxu0  ;;  %v725_v61 = vpop.f32.mrf.mxu1 }
  0xcc   :  { %528 = vst.msk [vmem:[%s1226_s3] sm:$0xff] %vm527_vm2, %v289_v58  ;;  %552 = vst.msk [vmem:[%s1226_s3 + $0xc0] sm:$0xff] %vm527_vm2, %v409_v59  ;;  %v304_v62 = vadd.f32 %v689_v60, %v981_v51  ;;  %v424_v63 = vadd.f32 %v725_v61, %v981_v51 }
  0xcd   :  { %v298_v0 = vpop.f32.mrf.mxu0  ;;  %v418_v1 = vpop.f32.mrf.mxu1 }
  0xce   :  { %531 = vst.msk [vmem:[%s1226_s3 + $0x18] sm:$0xff] %vm527_vm2, %v304_v62  ;;  %555 = vst.msk [vmem:[%s1226_s3 + $0xd8] sm:$0xff] %vm527_vm2, %v424_v63  ;;  %v299_v2 = vadd.f32 %v981_v51, %v298_v0  ;;  %v419_v3 = vadd.f32 %v981_v51, %v418_v1 }
  0xcf   :  { %v692_v4 = vpop.f32.mrf.mxu0  ;;  %v728_v5 = vpop.f32.mrf.mxu1 }
  0xd0   :  { %530 = vst.msk [vmem:[%s1226_s3 + $0x10] sm:$0xff] %vm527_vm2, %v299_v2  ;;  %554 = vst.msk [vmem:[%s1226_s3 + $0xd0] sm:$0xff] %vm527_vm2, %v419_v3  ;;  %v314_v6 = vadd.f32 %v692_v4, %v981_v51  ;;  %v434_v7 = vadd.f32 %v728_v5, %v981_v51 }
  0xd1   :  { %v308_v8 = vpop.f32.mrf.mxu0  ;;  %v428_v9 = vpop.f32.mrf.mxu1 }
  0xd2   :  { %533 = vst.msk [vmem:[%s1226_s3 + $0x28] sm:$0xff] %vm527_vm2, %v314_v6  ;;  %557 = vst.msk [vmem:[%s1226_s3 + $0xe8] sm:$0xff] %vm527_vm2, %v434_v7  ;;  %v309_v10 = vadd.f32 %v981_v51, %v308_v8  ;;  %v429_v11 = vadd.f32 %v981_v51, %v428_v9 }
  0xd3   :  { %v695_v12 = vpop.f32.mrf.mxu0  ;;  %v731_v13 = vpop.f32.mrf.mxu1 }
  0xd4   :  { %532 = vst.msk [vmem:[%s1226_s3 + $0x20] sm:$0xff] %vm527_vm2, %v309_v10  ;;  %556 = vst.msk [vmem:[%s1226_s3 + $0xe0] sm:$0xff] %vm527_vm2, %v429_v11  ;;  %v324_v14 = vadd.f32 %v695_v12, %v981_v51  ;;  %v444_v15 = vadd.f32 %v731_v13, %v981_v51 }
  0xd5   :  { %v318_v16 = vpop.f32.mrf.mxu0  ;;  %v438_v17 = vpop.f32.mrf.mxu1 }
  0xd6   :  { %535 = vst.msk [vmem:[%s1226_s3 + $0x38] sm:$0xff] %vm527_vm2, %v324_v14  ;;  %559 = vst.msk [vmem:[%s1226_s3 + $0xf8] sm:$0xff] %vm527_vm2, %v444_v15  ;;  %v319_v18 = vadd.f32 %v981_v51, %v318_v16  ;;  %v439_v19 = vadd.f32 %v981_v51, %v438_v17 }
  0xd7   :  { %v698_v20 = vpop.f32.mrf.mxu0  ;;  %v734_v21 = vpop.f32.mrf.mxu1 }
  0xd8   :  { %534 = vst.msk [vmem:[%s1226_s3 + $0x30] sm:$0xff] %vm527_vm2, %v319_v18  ;;  %558 = vst.msk [vmem:[%s1226_s3 + $0xf0] sm:$0xff] %vm527_vm2, %v439_v19  ;;  %v334_v22 = vadd.f32 %v698_v20, %v981_v51  ;;  %v454_v23 = vadd.f32 %v734_v21, %v981_v51 }
  0xd9   :  { %v328_v24 = vpop.f32.mrf.mxu0  ;;  %v448_v25 = vpop.f32.mrf.mxu1 }
  0xda   :  { %537 = vst.msk [vmem:[%s1226_s3 + $0x48] sm:$0xff] %vm527_vm2, %v334_v22  ;;  %561 = vst.msk [vmem:[%s1226_s3 + $0x108] sm:$0xff] %vm527_vm2, %v454_v23  ;;  %v329_v26 = vadd.f32 %v981_v51, %v328_v24  ;;  %v449_v27 = vadd.f32 %v981_v51, %v448_v25 }
  0xdb   :  { %v701_v28 = vpop.f32.mrf.mxu0  ;;  %v737_v29 = vpop.f32.mrf.mxu1 }
  0xdc   :  { %536 = vst.msk [vmem:[%s1226_s3 + $0x40] sm:$0xff] %vm527_vm2, %v329_v26  ;;  %560 = vst.msk [vmem:[%s1226_s3 + $0x100] sm:$0xff] %vm527_vm2, %v449_v27  ;;  %v344_v30 = vadd.f32 %v701_v28, %v981_v51  ;;  %v464_v31 = vadd.f32 %v737_v29, %v981_v51 }
  0xdd   :  { %v338_v32 = vpop.f32.mrf.mxu0  ;;  %v458_v33 = vpop.f32.mrf.mxu1 }
  0xde   :  { %539 = vst.msk [vmem:[%s1226_s3 + $0x58] sm:$0xff] %vm527_vm2, %v344_v30  ;;  %563 = vst.msk [vmem:[%s1226_s3 + $0x118] sm:$0xff] %vm527_vm2, %v464_v31  ;;  %v339_v34 = vadd.f32 %v981_v51, %v338_v32  ;;  %v459_v35 = vadd.f32 %v981_v51, %v458_v33 }
  0xdf   :  { %v704_v36 = vpop.f32.mrf.mxu0  ;;  %v740_v37 = vpop.f32.mrf.mxu1 }
  0xe0   :  { %538 = vst.msk [vmem:[%s1226_s3 + $0x50] sm:$0xff] %vm527_vm2, %v339_v34  ;;  %562 = vst.msk [vmem:[%s1226_s3 + $0x110] sm:$0xff] %vm527_vm2, %v459_v35  ;;  %v354_v38 = vadd.f32 %v704_v36, %v981_v51  ;;  %v474_v39 = vadd.f32 %v740_v37, %v981_v51 }
  0xe1   :  { %v348_v40 = vpop.f32.mrf.mxu0  ;;  %v468_v41 = vpop.f32.mrf.mxu1 }
  0xe2   :  { %541 = vst.msk [vmem:[%s1226_s3 + $0x68] sm:$0xff] %vm527_vm2, %v354_v38  ;;  %565 = vst.msk [vmem:[%s1226_s3 + $0x128] sm:$0xff] %vm527_vm2, %v474_v39  ;;  %v349_v42 = vadd.f32 %v981_v51, %v348_v40  ;;  %v469_v43 = vadd.f32 %v981_v51, %v468_v41 }
  0xe3   :  { %v707_v44 = vpop.f32.mrf.mxu0  ;;  %v743_v45 = vpop.f32.mrf.mxu1 }
  0xe4   :  { %540 = vst.msk [vmem:[%s1226_s3 + $0x60] sm:$0xff] %vm527_vm2, %v349_v42  ;;  %564 = vst.msk [vmem:[%s1226_s3 + $0x120] sm:$0xff] %vm527_vm2, %v469_v43  ;;  %v364_v46 = vadd.f32 %v707_v44, %v981_v51  ;;  %v484_v47 = vadd.f32 %v743_v45, %v981_v51 }
  0xe5   :  { %v358_v48 = vpop.f32.mrf.mxu0  ;;  %v478_v49 = vpop.f32.mrf.mxu1 }
  0xe6   :  { %543 = vst.msk [vmem:[%s1226_s3 + $0x78] sm:$0xff] %vm527_vm2, %v364_v46  ;;  %567 = vst.msk [vmem:[%s1226_s3 + $0x138] sm:$0xff] %vm527_vm2, %v484_v47  ;;  %v359_v50 = vadd.f32 %v981_v51, %v358_v48  ;;  %v479_v52 = vadd.f32 %v981_v51, %v478_v49 }
  0xe7   :  { %v710_v53 = vpop.f32.mrf.mxu0  ;;  %v746_v54 = vpop.f32.mrf.mxu1 }
  0xe8   :  { %542 = vst.msk [vmem:[%s1226_s3 + $0x70] sm:$0xff] %vm527_vm2, %v359_v50  ;;  %566 = vst.msk [vmem:[%s1226_s3 + $0x130] sm:$0xff] %vm527_vm2, %v479_v52  ;;  %v374_v55 = vadd.f32 %v710_v53, %v981_v51  ;;  %v494_v56 = vadd.f32 %v746_v54, %v981_v51 }
  0xe9   :  { %v368_v57 = vpop.f32.mrf.mxu0  ;;  %v488_v58 = vpop.f32.mrf.mxu1 }
  0xea   :  { %545 = vst.msk [vmem:[%s1226_s3 + $0x88] sm:$0xff] %vm527_vm2, %v374_v55  ;;  %569 = vst.msk [vmem:[%s1226_s3 + $0x148] sm:$0xff] %vm527_vm2, %v494_v56  ;;  %v369_v59 = vadd.f32 %v981_v51, %v368_v57  ;;  %v489_v60 = vadd.f32 %v981_v51, %v488_v58 }
  0xeb   :  { %v713_v61 = vpop.f32.mrf.mxu0  ;;  %v749_v62 = vpop.f32.mrf.mxu1 }
  0xec   :  { %544 = vst.msk [vmem:[%s1226_s3 + $0x80] sm:$0xff] %vm527_vm2, %v369_v59  ;;  %568 = vst.msk [vmem:[%s1226_s3 + $0x140] sm:$0xff] %vm527_vm2, %v489_v60  ;;  %v384_v63 = vadd.f32 %v713_v61, %v981_v51  ;;  %v504_v0 = vadd.f32 %v749_v62, %v981_v51 }
  0xed   :  { %v378_v1 = vpop.f32.mrf.mxu0  ;;  %v498_v2 = vpop.f32.mrf.mxu1 }
  0xee   :  { %547 = vst.msk [vmem:[%s1226_s3 + $0x98] sm:$0xff] %vm527_vm2, %v384_v63  ;;  %571 = vst.msk [vmem:[%s1226_s3 + $0x158] sm:$0xff] %vm527_vm2, %v504_v0  ;;  %v379_v3 = vadd.f32 %v981_v51, %v378_v1  ;;  %v499_v4 = vadd.f32 %v981_v51, %v498_v2 }
  0xef   :  { %v716_v5 = vpop.f32.mrf.mxu0  ;;  %v752_v6 = vpop.f32.mrf.mxu1 }
  0xf0   :  { %546 = vst.msk [vmem:[%s1226_s3 + $0x90] sm:$0xff] %vm527_vm2, %v379_v3  ;;  %570 = vst.msk [vmem:[%s1226_s3 + $0x150] sm:$0xff] %vm527_vm2, %v499_v4  ;;  %v394_v7 = vadd.f32 %v716_v5, %v981_v51  ;;  %v514_v8 = vadd.f32 %v752_v6, %v981_v51 }
  0xf1   :  { %v388_v9 = vpop.f32.mrf.mxu0  ;;  %v508_v10 = vpop.f32.mrf.mxu1 }
  0xf2   :  { %549 = vst.msk [vmem:[%s1226_s3 + $0xa8] sm:$0xff] %vm527_vm2, %v394_v7  ;;  %573 = vst.msk [vmem:[%s1226_s3 + $0x168] sm:$0xff] %vm527_vm2, %v514_v8  ;;  %v389_v11 = vadd.f32 %v981_v51, %v388_v9  ;;  %v509_v12 = vadd.f32 %v981_v51, %v508_v10 }
  0xf3   :  { %v719_v13 = vpop.f32.mrf.mxu0  ;;  %v755_v14 = vpop.f32.mrf.mxu1 }
  0xf4   :  { %548 = vst.msk [vmem:[%s1226_s3 + $0xa0] sm:$0xff] %vm527_vm2, %v389_v11  ;;  %572 = vst.msk [vmem:[%s1226_s3 + $0x160] sm:$0xff] %vm527_vm2, %v509_v12  ;;  %v404_v15 = vadd.f32 %v719_v13, %v981_v51  ;;  %v524_v16 = vadd.f32 %v755_v14, %v981_v51 }
  0xf5   :  { %v398_v17 = vpop.f32.mrf.mxu0  ;;  %v518_v18 = vpop.f32.mrf.mxu1 }
  0xf6   :  { %551 = vst.msk [vmem:[%s1226_s3 + $0xb8] sm:$0xff] %vm527_vm2, %v404_v15  ;;  %575 = vst.msk [vmem:[%s1226_s3 + $0x178] sm:$0xff] %vm527_vm2, %v524_v16  ;;  %v399_v19 = vadd.f32 %v981_v51, %v398_v17  ;;  %v519_v20 = vadd.f32 %v981_v51, %v518_v18 }
  0xf8   :  { %550 = vst.msk [vmem:[%s1226_s3 + $0xb0] sm:$0xff] %vm527_vm2, %v399_v19  ;;  %574 = vst.msk [vmem:[%s1226_s3 + $0x170] sm:$0xff] %vm527_vm2, %v519_v20 }

</bundles_post_ra>
